<compile_context>
chip_gen: v6e
topology: v6e:2x2x1
jax: 0.10.0
libtpu: 0.0.40
codegen_flags: <defaults>
</compile_context>

<pallas_src>
import functools

import jax
import jax.numpy as jnp
from jax import lax
from jax.experimental import pallas as pl
from jax.experimental.pallas import tpu as pltpu

N_FACTORS = 32
DROPOUT_P = 0.3

# Lane tile (batch elements per grid step).  Perf-review targets: ~16384 on v6e,
# up to ~32768 on v7x, cap ~8192 on v5e if staging f32.  With the default bf16
# staging, 16384 keeps double-buffered inputs at ~4 MiB, which fits every
# generation's default scoped VMEM.
TILE_B = 16384
# In-kernel lane chunk: the [F, TILE_B] DMA tile is processed in chunks of this
# many lanes so vreg pressure stays bounded (a [1, 16384] f32 row alone is 128 vregs).
LANE_CHUNK = 512


# ------------------------------ helpers ------------------------------------ #

def _round_up(x, m):
    return ((x + m - 1) // m) * m


def _cdiv(a, b):
    return (a + b - 1) // b


def _u32(x):
    return jnp.asarray(x).astype(jnp.uint32)


def _mix32(x):
    # "lowbias32" finalizer: cheap all-VALU 32-bit mixer with good avalanche.
    x = jnp.bitwise_xor(x, jnp.right_shift(x, 16))
    x = x * jnp.uint32(0x7FEB352D)
    x = jnp.bitwise_xor(x, jnp.right_shift(x, 15))
    x = x * jnp.uint32(0x846CA68B)
    x = jnp.bitwise_xor(x, jnp.right_shift(x, 16))
    return x


def _foreach_chunk(nchunks, fn):
    # Unrolled fori_loop (rather than a plain Python for) so live ranges stay
    # bounded per chunk; single-chunk case stays a static slice.
    if nchunks == 1:
        fn(0)
        return

    def body(c, carry):
        fn(c)
        return carry

    lax.fori_loop(0, nchunks, body, 0, unroll=True)


def _lane_slice(c, chunk):
    off = c * chunk
    if isinstance(off, int):
        return pl.ds(off, chunk)
    return pl.ds(pl.multiple_of(off, chunk), chunk)


# ------------------------------ kernels ------------------------------------ #

def _dot_kernel_eval(u_ref, v_ref, o_ref, *, chunk):
    # u_ref/v_ref: [F, TB] (bf16 or f32); o_ref: [1, TB] f32 (lane-dense).
    _, TB = u_ref.shape

    def one_chunk(c):
        sl = _lane_slice(c, chunk)
        u = u_ref[:, sl].astype(jnp.float32)
        v = v_ref[:, sl].astype(jnp.float32)
        o_ref[:, sl] = jnp.sum(u * v, axis=0, keepdims=True).astype(o_ref.dtype)

    _foreach_chunk(TB // chunk, one_chunk)


def _dot_kernel_train(seed_ref, u_ref, v_ref, o_ref, *, thresh16, inv_keep2, chunk):
    # Inverted dropout fused into the dot product:
    #   dropout(u) . dropout(v) = sum_f u*v*keep_u*keep_v / keep_prob^2
    # One hash word per element gives two independent 16-bit keep tests
    # (low16 -> user mask, high16 -> item mask).
    # TODO(synk): not bit-exact with torch's RNG; on hardware this hash could be
    # replaced by pltpu.prng_random_bits (no interpret-mode lowering for it).
    F, TB = u_ref.shape
    seed = _u32(seed_ref[0]) * jnp.uint32(0xC2B2AE35)
    base_col = _u32(pl.program_id(0)) * jnp.uint32(TB)
    thresh = jnp.uint32(thresh16)
    scale2 = jnp.float32(inv_keep2)
    # Hoisted broadcasts (JAX does not CSE broadcast_in_dim inside the loop).
    row_mix = lax.broadcasted_iota(jnp.int32, (F, chunk), 0).astype(jnp.uint32) \
        * jnp.uint32(0x85EBCA77)
    col_iota = lax.broadcasted_iota(jnp.int32, (F, chunk), 1).astype(jnp.uint32)

    def one_chunk(c):
        sl = _lane_slice(c, chunk)
        u = u_ref[:, sl].astype(jnp.float32)
        v = v_ref[:, sl].astype(jnp.float32)
        # Absolute batch column -> mask is independent of tile/chunk choices.
        gcol = col_iota + base_col + _u32(c) * jnp.uint32(chunk)
        x = _mix32(gcol * jnp.uint32(0x9E3779B1) + row_mix + seed)
        keep = jnp.logical_and(
            jnp.bitwise_and(x, jnp.uint32(0xFFFF)) >= thresh,
            jnp.right_shift(x, 16) >= thresh,
        )
        prod = jnp.where(keep, u * v, 0.0)
        o_ref[:, sl] = (jnp.sum(prod, axis=0, keepdims=True) * scale2).astype(o_ref.dtype)

    _foreach_chunk(TB // chunk, one_chunk)


# ------------------------------ wrapper ------------------------------------ #

def base_model_forward(params, users, items, *, training=False, dropout_p=DROPOUT_P,
                       seed=0, tile_b=TILE_B, emb_dtype=jnp.bfloat16):
    """Forward pass of BaseModel; returns [B, 1] float32."""
    B = int(users.shape[0])
    tbl_u = params["user_embeddings"]
    tbl_i = params["item_embeddings"]
    F = int(tbl_u.shape[1])

    # ---- lane-tile / padding selection (over-padding bounded by one chunk) ----
    b128 = _round_up(max(B, 1), 128)
    if b128 <= LANE_CHUNK:
        tb, ntiles = b128, 1
    else:
        cap = max(_round_up(int(tile_b), LANE_CHUNK), LANE_CHUNK)
        ntiles = _cdiv(b128, cap)
        tb = _round_up(_cdiv(b128, ntiles), LANE_CHUNK)
    B_pad = tb * ntiles
    chunk = min(LANE_CHUNK, tb)

    users_p = jnp.pad(users.astype(jnp.int32), (0, B_pad - B))
    items_p = jnp.pad(items.astype(jnp.int32), (0, B_pad - B))

    # Gather from transposed, staged-dtype tables: the transpose only touches the
    # tiny [n_rows, F] tables, and the big activation comes out as [F, B_pad]
    # directly (no post-gather transpose; gather moves bf16 bytes).
    # TODO(synk): if the tables are known to fit VMEM, fuse the gather into the
    # kernel via resident table blocks + scalar-prefetched index tiles.
    u_t = jnp.take(tbl_u.astype(emb_dtype).T, users_p, axis=1)   # [F, B_pad]
    v_t = jnp.take(tbl_i.astype(emb_dtype).T, items_p, axis=1)   # [F, B_pad]

    grid = (ntiles,)
    out_shape = jax.ShapeDtypeStruct((1, B_pad), jnp.float32)
    # TODO(synk): on v7x, consider CORE_PARALLEL semantics if one TensorCore
    # profiles idle; plain "parallel" is correct on every generation.
    cparams = pltpu.CompilerParams(dimension_semantics=("parallel",))

    p = float(dropout_p)
    if (not training) or p == 0.0:
        kernel = functools.partial(_dot_kernel_eval, chunk=chunk)
        emb_spec = pl.BlockSpec((F, tb), lambda b: (0, b))
        out_spec = pl.BlockSpec((1, tb), lambda b: (0, b))
        out = pl.pallas_call(
            kernel,
            out_shape=out_shape,
            grid=grid,
            in_specs=[emb_spec, emb_spec],
            out_specs=out_spec,
            compiler_params=cparams,
        )(u_t, v_t)
    else:
        assert 0.0 < p < 1.0, "dropout_p must be in [0, 1)"
        thresh16 = min(max(int(p * 65536.0), 0), 65535)
        keep_prob = (65536 - thresh16) / 65536.0   # realized (16-bit quantized) keep prob
        kernel = functools.partial(_dot_kernel_train, thresh16=thresh16,
                                   inv_keep2=1.0 / (keep_prob * keep_prob), chunk=chunk)
        seed_arr = jnp.array([seed], dtype=jnp.int32)
        emb_spec = pl.BlockSpec((F, tb), lambda b, seed_ref: (0, b))
        out_spec = pl.BlockSpec((1, tb), lambda b, seed_ref: (0, b))
        out = pl.pallas_call(
            kernel,
            out_shape=out_shape,
            grid_spec=pltpu.PrefetchScalarGridSpec(
                num_scalar_prefetch=1,
                grid=grid,
                in_specs=[emb_spec, emb_spec],
                out_specs=out_spec,
            ),
            compiler_params=cparams,
        )(seed_arr, u_t, v_t)

    return out[0, :B].reshape(B, 1)


# ------------------------------ params ------------------------------------- #

def init_params(key, n_users, n_items, n_factors=N_FACTORS):
    k1, k2, k3, k4 = jax.random.split(key, 4)
    # nn.Embedding default init: N(0, 1). Biases unused in forward (kept for parity).
    return {
        "user_biases": jax.random.normal(k1, (n_users, 1), jnp.float32),
        "item_biases": jax.random.normal(k2, (n_items, 1), jnp.float32),
        "user_embeddings": jax.random.normal(k3, (n_users, n_factors), jnp.float32),
        "item_embeddings": jax.random.normal(k4, (n_items, n_factors), jnp.float32),
    }


# -------------------------------- main -------------------------------------- #

if __name__ == "__main__":
    N_USERS, N_ITEMS, F = 64, 100, N_FACTORS
    B = 16

    key = jax.random.PRNGKey(0)
    kp, ku, ki, ku2, ki2 = jax.random.split(key, 5)

    params = init_params(kp, N_USERS, N_ITEMS, F)
    users = jax.random.randint(ku, (B,), 0, N_USERS, dtype=jnp.int32)
    items = jax.random.randint(ki, (B,), 0, N_ITEMS, dtype=jnp.int32)

    def ref_dot(users_, items_, emb_dtype):
        u = jnp.take(params["user_embeddings"], users_, axis=0).astype(emb_dtype).astype(jnp.float32)
        v = jnp.take(params["item_embeddings"], items_, axis=0).astype(emb_dtype).astype(jnp.float32)
        return jnp.sum(u * v, axis=-1, keepdims=True)

    # 1) eval, f32 staging: exact vs reference.
    out_f32 = jax.block_until_ready(
        base_model_forward(params, users, items, training=False, emb_dtype=jnp.float32))
    ref_f32 = ref_dot(users, items, jnp.float32)
    assert out_f32.shape == (B, 1), out_f32.shape
    assert jnp.allclose(out_f32, ref_f32, atol=1e-5, rtol=1e-5), "eval(f32) mismatch"

    # 2) eval, default bf16 staging vs bf16-staged reference.
    out_bf = jax.block_until_ready(base_model_forward(params, users, items, training=False))
    ref_bf = ref_dot(users, items, jnp.bfloat16)
    assert jnp.allclose(out_bf, ref_bf, atol=1e-3, rtol=1e-3), "eval(bf16) mismatch"

    # 3) training kernel exactness with a vanishing dropout rate (keep-all mask,
    #    unit rescale): exercises the hash-RNG path deterministically.
    out_tr0 = jax.block_until_ready(
        base_model_forward(params, users, items, training=True, dropout_p=1e-9,
                           seed=7, emb_dtype=jnp.float32))
    assert jnp.allclose(out_tr0, ref_f32, atol=1e-5, rtol=1e-5), "train(p~0) mismatch"

    # 4) training with real dropout: shape / finiteness.
    out_tr = jax.block_until_ready(
        base_model_forward(params, users, items, training=True, dropout_p=DROPOUT_P, seed=7))
    assert out_tr.shape == (B, 1)
    assert bool(jnp.all(jnp.isfinite(out_tr)))

    # 5) larger batch: multi-tile grid + in-kernel lane chunking, and dropout-mask
    #    reproducibility across different lane-tile choices (absolute-index RNG).
    B2 = 1100
    users2 = jax.random.randint(ku2, (B2,), 0, N_USERS, dtype=jnp.int32)
    items2 = jax.random.randint(ki2, (B2,), 0, N_ITEMS, dtype=jnp.int32)
    ref2 = ref_dot(users2, items2, jnp.bfloat16)
    out2_small = jax.block_until_ready(
        base_model_forward(params, users2, items2, training=False, tile_b=512))
    out2_big = jax.block_until_ready(
        base_model_forward(params, users2, items2, training=False))
    assert jnp.allclose(out2_small, ref2, atol=1e-3, rtol=1e-3), "eval multi-tile mismatch"
    assert jnp.allclose(out2_big, ref2, atol=1e-3, rtol=1e-3), "eval multi-chunk mismatch"

    tr_a = jax.block_until_ready(
        base_model_forward(params, users2, items2, training=True, dropout_p=DROPOUT_P,
                           seed=123, tile_b=512))
    tr_b = jax.block_until_ready(
        base_model_forward(params, users2, items2, training=True, dropout_p=DROPOUT_P,
                           seed=123))
    assert jnp.allclose(tr_a, tr_b, atol=1e-4, rtol=1e-4), "dropout mask not tile-invariant"

    print("KERNEL_OK")
</pallas_src>

<mosaic_0001>
module attributes {stable_mosaic.version = 11 : i64} {
  func.func @_dot_kernel_eval(%arg0: i32, %arg1: memref<32x128xf32, #tpu.memory_space<vmem>>, %arg2: memref<32x128xf32, #tpu.memory_space<vmem>>, %arg3: memref<1x128xf32, #tpu.memory_space<vmem>>) attributes {dimension_semantics = [#tpu.dimension_semantics<parallel>], iteration_bounds = array<i64: 1>, scalar_prefetch = 0 : i64, scratch_operands = 0 : i64, tpu.core_type = #tpu.core_type<tc>, window_params = [{transform_indices = @transform_0, window_bounds = array<i64: 32, 128>}, {transform_indices = @transform_1, window_bounds = array<i64: 32, 128>}, {transform_indices = @transform_2, window_bounds = array<i64: 1, 128>}]} {
    %c0 = arith.constant 0 : index
    %c0_0 = arith.constant 0 : index
    %0 = vector.load %arg1[%c0, %c0_0] : memref<32x128xf32, #tpu.memory_space<vmem>>, vector<32x128xf32>
    %c0_1 = arith.constant 0 : index
    %c0_2 = arith.constant 0 : index
    %1 = vector.load %arg2[%c0_1, %c0_2] : memref<32x128xf32, #tpu.memory_space<vmem>>, vector<32x128xf32>
    %2 = arith.mulf %0, %1 : vector<32x128xf32>
    %cst = arith.constant dense<0.000000e+00> : vector<128xf32>
    %3 = vector.multi_reduction <add>, %2, %cst [0] : vector<32x128xf32> to vector<128xf32>
    %4 = vector.shape_cast %3 : vector<128xf32> to vector<1x128xf32>
    %c0_3 = arith.constant 0 : index
    %c0_4 = arith.constant 0 : index
    %5 = vector.load %arg3[%c0_3, %c0_4] : memref<1x128xf32, #tpu.memory_space<vmem>>, vector<1x128xf32>
    tpu.vector_store %arg3[%c0_3, %c0_4], %4 {strides = array<i32>} : memref<1x128xf32, #tpu.memory_space<vmem>>, vector<1x128xf32>,
    return
  }
  func.func @transform_0(%arg0: i32) -> (i32, i32) {
    %c0_i32 = arith.constant 0 : i32
    %c0_i32_0 = arith.constant 0 : i32
    return %c0_i32, %arg0 : i32, i32
  }
  func.func @transform_1(%arg0: i32) -> (i32, i32) {
    %c0_i32 = arith.constant 0 : i32
    %c0_i32_0 = arith.constant 0 : i32
    return %c0_i32, %arg0 : i32, i32
  }
  func.func @transform_2(%arg0: i32) -> (i32, i32) {
    %c0_i32 = arith.constant 0 : i32
    %c0_i32_0 = arith.constant 0 : i32
    return %c0_i32, %arg0 : i32, i32
  }
}

</mosaic_0001>

<bundles_post_ra>
// kernel: tpu_custom_call.1
= control target key start
LH: loop header
LB: loop body
LE: loop exit
PB: predicated region body
PF: predicated region fallthrough
CT: control target
= control target key end

     0   :  { %7 = vsyncpa [#allocation3], 0  ;;  %s178_s0 = inlined_call_operand.hbm [shape: f32[32,128], index: 0, kind: input, shape index: {}]   ;;  %s179_s1 = inlined_call_operand.hbm [shape: f32[32,128], index: 1, kind: input, shape index: {}]   ;;  %s180_s2 = inlined_call_operand.hbm [shape: f32[1,128], index: 2, kind: output, shape index: {}]  }
   0x1   :  { %8 = vsyncpa [#allocation6], 0 }
   0x2   :  { %9 = vsyncpa [#allocation4], 0  ;;  %s149_s9 = smov [#allocation2]  }
   0x3   :  { %s15_s10 = sshll.u32 %s149_s9, 4  ;;  %s16_s10 = int_to_ptr.vmem [resolvable:$true] %s15_s10 }
   0x4   :  { %s91_s11 = scalar_lea.vmem %s16_s10, 512  ;;  %p96_p1 = scmp.lt.s32.totalorder %s16_s10, %s16_s10 }
   0x5   :  { %p92_p0 = scmp.ne.s32.totalorder %s16_s10, %s91_s11  ;;  %p97_p2 = scmp.lt.s32.totalorder %s91_s11, %s91_s11 }
   0x7   :  { %p98_p3 = por %p97_p2, %p96_p1 }
   0x9   :  { %p99_p4 = pnand %p98_p3, %p92_p0 }
   0xb   :  { %102 = shalt.err (!%p99_p4)
}
   0xc   :  { %s150_s12 = smov 128   ;;  %s151_s13 = smov 8  }
   0xd   :  { %21 = dma.hbm_to_vmem [thread:$0]  %s178_s0, 512, %s16_s10, [#allocation3], %s150_s12, %s150_s12, %s151_s13  }
   0xe   :  { %s152_s16 = smov [#allocation5]  }
   0xf   :  { %s27_s17 = sshll.u32 %s152_s16, 4  ;;  %s28_s17 = int_to_ptr.vmem [resolvable:$true] %s27_s17 }
  0x10   :  { %s111_s18 = scalar_lea.vmem %s28_s17, 512  ;;  %p116_p6 = scmp.lt.s32.totalorder %s28_s17, %s28_s17 }
  0x11   :  { %p112_p5 = scmp.ne.s32.totalorder %s28_s17, %s111_s18  ;;  %p117_p7 = scmp.lt.s32.totalorder %s111_s18, %s111_s18 }
  0x13   :  { %p118_p8 = por %p117_p7, %p116_p6 }
  0x15   :  { %p119_p9 = pnand %p118_p8, %p112_p5 }
  0x17   :  { %122 = shalt.err (!%p119_p9)
}
  0x18   :  { %33 = dma.hbm_to_vmem [thread:$0]  %s179_s1, 512, %s28_s17, [#allocation6], %s150_s12, %s150_s12, %s151_s13  }
  0x19   :  { %143 = dma.done.wait [#allocation3], 512  }
  0x1a   :  { %144 = vsyncadd [#allocation3], 4294966784 }
  0x1b   :  { %145 = dma.done.wait [#allocation6], 512  }
  0x1c   :  { %146 = vsyncadd [#allocation6], 4294966784  ;;  %v40_v0 = vld [vmem:[#allocation2] sm:$0xff]  ;;  %v41_v1 = vld [vmem:[#allocation2 + $0x8] sm:$0xff]  ;;  %s153_s0 = smov [#allocation7]  }
  0x1d   :  { %v42_v2 = vld [vmem:[#allocation2 + $0x10] sm:$0xff]  ;;  %v43_v3 = vld [vmem:[#allocation2 + $0x18] sm:$0xff]  ;;  %v44_v4 = vld [vmem:[#allocation5] sm:$0xff]  ;;  %s68_s1 = sshll.u32 %s153_s0, 4  ;;  %s69_s1 = int_to_ptr.vmem [resolvable:$true] %s68_s1 }
  0x1e   :  { %v45_v5 = vld [vmem:[#allocation5 + $0x8] sm:$0xff]  ;;  %v46_v6 = vld [vmem:[#allocation5 + $0x10] sm:$0xff]  ;;  %v47_v7 = vld [vmem:[#allocation5 + $0x18] sm:$0xff]  ;;  %v48_v8 = vmul.f32 %v44_v4, %v40_v0  ;;  %s123_s21 = scalar_lea.vmem %s69_s1, 16  ;;  %s127_s22 = scalar_lea.vmem %s69_s1, 32 }
  0x1f   :  { %v49_v9 = vmul.f32 %v45_v5, %v41_v1  ;;  %v50_v10 = vmul.f32 %v46_v6, %v42_v2  ;;  %v51_v11 = vmul.f32 %v47_v7, %v43_v3  ;;  %p124_p10 = scmp.ne.s32.totalorder %s69_s1, %s123_s21  ;;  %p128_p11 = scmp.lt.s32.totalorder %s69_s1, %s69_s1 }
  0x20   :  { %p129_p12 = scmp.lt.s32.totalorder %s127_s22, %s123_s21 }
  0x21   :  { %v52_v12 = vadd.f32 %v49_v9, %v48_v8 }
  0x22   :  { %p130_p13 = por %p129_p12, %p128_p11 }
  0x23   :  { %v53_v13 = vadd.f32 %v52_v12, %v50_v10 }
  0x24   :  { %p131_p0 = pnand %p130_p13, %p124_p10 }
  0x25   :  { %v54_v14 = vadd.f32 %v53_v13, %v51_v11 }
  0x27   :  { %v55_v15 = vrot.slane %v54_v14, 4 }
  0x29   :  { %v56_v16 = vadd.f32 %v55_v15, %v54_v14 }
  0x2b   :  { %v57_v17 = vrot.slane %v56_v16, 2 }
  0x2d   :  { %v58_v18 = vadd.f32 %v57_v17, %v56_v16 }
  0x2f   :  { %v59_v19 = vrot.slane %v58_v18, 1 }
  0x31   :  { %v60_v20 = vadd.f32 %v59_v19, %v58_v18 }
  0x33   :  { %61 = vst [vmem:[#allocation7] sm:$0x1] %v60_v20 }
  0x34   :  { %134 = shalt.err (!%p131_p0)
}
  0x35   :  { %71 = dma.vmem_to_hbm [thread:$0]  %s69_s1, 16, %s180_s2, [#allocation4]  }
  0x36   :  { %147 = dma.done.wait [#allocation4], 16  }
  0x37   :  { %148 = vsyncadd [#allocation4], 4294967280 }
  0x38   :  { %75 = vsyncpa [#allocation3], 1 }
  0x39   :  { %76 = vsyncpa [#allocation6], 1 }
  0x3a   :  { %77 = vsyncpa [#allocation4], 1 }

</bundles_post_ra>
